<compile_context>
chip_gen: v6e
topology: v6e:2x2x1
jax: 0.10.0
libtpu: 0.0.40
codegen_flags: <defaults>
</compile_context>

<pallas_src>
import functools
import math

import jax
import jax.numpy as jnp
from jax import lax
from jax.experimental import pallas as pl
from jax.experimental.pallas import tpu as pltpu


_BN_EPS = 1e-5


# ----------------------------------------------------------------------------
# Parameter setup (deterministic) + BN fusion
# ----------------------------------------------------------------------------
def make_focus_params(key, c1, c2):
    """Params matching nn.Conv2d(4*c1, c2, 1, bias=False) + nn.BatchNorm2d(c2)."""
    k1, k2, k3, k4, k5 = jax.random.split(key, 5)
    c_in = 4 * c1
    w = jax.random.normal(k1, (c2, c_in, 1, 1), jnp.float32) * 0.1   # OIHW
    gamma = 1.0 + 0.1 * jax.random.normal(k2, (c2,), jnp.float32)
    beta = 0.1 * jax.random.normal(k3, (c2,), jnp.float32)
    rmean = 0.1 * jax.random.normal(k4, (c2,), jnp.float32)
    rvar = 0.5 + jax.random.uniform(k5, (c2,), jnp.float32)          # > 0
    return dict(w=w, gamma=gamma, beta=beta, rmean=rmean, rvar=rvar)


def _fuse_conv_bn(p):
    """Fold eval-mode BN into the 1x1 conv: (Cout, 4C) weight, (Cout,) bias."""
    scale = p["gamma"] / jnp.sqrt(p["rvar"] + _BN_EPS)
    shift = p["beta"] - p["rmean"] * scale
    w_f = p["w"][:, :, 0, 0] * scale[:, None]
    return w_f, shift


def _pack_weight_branches(w_f, c_in):
    """(Cout, 4C) -> (4, Cout, C): one slab per (row, col) parity branch,
    in torch.cat order [(0,0), (1,0), (0,1), (1,1)]."""
    cout = w_f.shape[0]
    return w_f.reshape(cout, 4, c_in).transpose(1, 0, 2)


# ----------------------------------------------------------------------------
# Primary kernel: fused space-to-depth + 1x1 conv (+BN bias) + Hardswish.
# The input tile is a contiguous slab of row-pairs of the RAW image; the
# stride-2 deinterleave happens here in VMEM (XLU/VPU slack -- HBM-bound).
# ----------------------------------------------------------------------------
def _focus_fused_kernel(x_ref, w_ref, b_ref, o_ref):
    # x_ref: (1, C, tho, 2*W)  lane axis = [row 2h (W cols) | row 2h+1 (W cols)]
    # w_ref: (4, Cout, C)      BN-folded weights, one slab per (r, s) branch
    # b_ref: (Cout, 1)         BN-folded bias
    # o_ref: (1, Cout, tho*Wo) lane-dense pixel tile
    _, C, tho, W2 = x_ref.shape
    W = W2 // 2
    Wo = W // 2
    P = tho * Wo

    acc = None
    # torch.cat order: (r, s) = (0,0), (1,0), (0,1), (1,1) -> lane starts 0, W, 1, W+1
    for i, start in enumerate((0, W, 1, W + 1)):
        part = x_ref[0, :, :, pl.ds(start, Wo, stride=2)]        # (C, tho, Wo)
        part = part.reshape(C, P)                                 # pixels -> lanes
        y_i = jnp.dot(w_ref[i], part, preferred_element_type=jnp.float32)
        acc = y_i if acc is None else acc + y_i

    y = acc + b_ref[...]                                          # (Cout, P) + (Cout, 1)
    y = y * jnp.clip(y + 3.0, 0.0, 6.0) * (1.0 / 6.0)             # Hardswish, f32
    o_ref[0] = y.astype(o_ref.dtype)


def _pick_row_tile(Ho, Wo, target_pixels):
    """Rows per tile: multiple of 8 (sublane rule) AND tho*Wo a multiple of 128
    (lane-dense unmasked output stores); otherwise take all rows (always legal)."""
    g = 128 // math.gcd(Wo, 128)           # row-count multiple for tho*Wo % 128 == 0
    step = 8 * g // math.gcd(8, g)         # lcm(8, g)
    tho = max(step, (max(target_pixels // Wo, 1) // step) * step)
    return Ho if tho >= Ho else tho


@functools.partial(jax.jit, static_argnames=("tm",))
def _focus_forward_fused(params, x, *, tm=8192):
    B, C, H, W = x.shape
    Ho, Wo = H // 2, W // 2
    M, K = Ho * Wo, 4 * C

    w_f, b_f = _fuse_conv_bn(params)                    # (Cout, 4C), (Cout,)
    Cout = w_f.shape[0]
    w4 = _pack_weight_branches(w_f, C)                  # (4, Cout, C)

    # Free metadata reshape: row ho of the view holds original rows (2ho, 2ho+1)
    # back-to-back on the lane axis.  No data movement, no HBM intermediate.
    x_rows = x.reshape(B, C, Ho, 2 * W)

    tho = _pick_row_tile(Ho, Wo, tm)
    n_tiles = pl.cdiv(Ho, tho)

    # v7x: deeper input pipelining when there are enough tiles to pipeline over;
    # tiles are tiny, so the extra buffer costs ~nothing in VMEM.
    x_spec_kwargs = {}
    if n_tiles >= 4:
        x_spec_kwargs["pipeline_mode"] = pl.Buffered(3)

    itemsize = x.dtype.itemsize
    cost = pl.CostEstimate(
        flops=2 * B * Cout * K * M,
        transcendentals=0,
        bytes_accessed=(x.size + w4.size + Cout + B * Cout * M) * itemsize,
    )

    out = pl.pallas_call(
        _focus_fused_kernel,
        out_shape=jax.ShapeDtypeStruct((B, Cout, M), x.dtype),
        grid=(B, n_tiles),
        in_specs=[
            pl.BlockSpec((1, C, tho, 2 * W), lambda b, m: (b, 0, m, 0),
                         **x_spec_kwargs),
            pl.BlockSpec((4, Cout, C), lambda b, m: (0, 0, 0)),
            pl.BlockSpec((Cout, 1), lambda b, m: (0, 0)),
        ],
        out_specs=pl.BlockSpec((1, Cout, tho * Wo), lambda b, m: (b, 0, m)),
        # Both axes independent; on v7x the runtime may shard them across the
        # two TensorCores (switch batch axis to pltpu.CORE_PARALLEL if not).
        compiler_params=pltpu.CompilerParams(
            dimension_semantics=("parallel", "parallel")),
        cost_estimate=cost,
    )(x_rows, w4, b_f.reshape(Cout, 1))

    return out.reshape(B, Cout, Ho, Wo)                 # free metadata reshape


# ----------------------------------------------------------------------------
# Fallback path (insurance only): pre-sliced stride-2 sub-grids as 4 inputs,
# with allow_input_fusion so XLA may fuse the slice producers into the input
# DMAs instead of materializing them.  Used only if the fused path fails to
# lower on the local toolchain.
# ----------------------------------------------------------------------------
def _focus_slices_kernel(x00_ref, x10_ref, x01_ref, x11_ref, w_ref, b_ref, o_ref):
    acc = None
    for i, xr in enumerate((x00_ref, x10_ref, x01_ref, x11_ref)):
        y_i = jnp.dot(w_ref[i], xr[0], preferred_element_type=jnp.float32)
        acc = y_i if acc is None else acc + y_i
    y = acc + b_ref[...]
    y = y * jnp.clip(y + 3.0, 0.0, 6.0) * (1.0 / 6.0)
    o_ref[0] = y.astype(o_ref.dtype)


def _space_to_depth_slices(x):
    B, C, H, W = x.shape
    Ho, Wo = H // 2, W // 2
    return (x[:, :, 0::2, 0::2].reshape(B, C, Ho * Wo),
            x[:, :, 1::2, 0::2].reshape(B, C, Ho * Wo),
            x[:, :, 0::2, 1::2].reshape(B, C, Ho * Wo),
            x[:, :, 1::2, 1::2].reshape(B, C, Ho * Wo))


def _pick_pixel_tile(M, target_pixels):
    if target_pixels >= M or M < 128:
        return M
    return max(128, (target_pixels // 128) * 128)


@functools.partial(jax.jit, static_argnames=("tm",))
def _focus_forward_sliced(params, x, *, tm=8192):
    B, C, H, W = x.shape
    Ho, Wo = H // 2, W // 2
    M, K = Ho * Wo, 4 * C

    w_f, b_f = _fuse_conv_bn(params)
    Cout = w_f.shape[0]
    w4 = _pack_weight_branches(w_f, C)

    slices = _space_to_depth_slices(x)                  # 4 x (B, C, M)
    tp = _pick_pixel_tile(M, tm)
    n_tiles = pl.cdiv(M, tp)

    itemsize = x.dtype.itemsize
    cost = pl.CostEstimate(
        flops=2 * B * Cout * K * M,
        transcendentals=0,
        bytes_accessed=(x.size + w4.size + Cout + B * Cout * M) * itemsize,
    )

    slice_spec = pl.BlockSpec((1, C, tp), lambda b, m: (b, 0, m))
    out = pl.pallas_call(
        _focus_slices_kernel,
        out_shape=jax.ShapeDtypeStruct((B, Cout, M), x.dtype),
        grid=(B, n_tiles),
        in_specs=[slice_spec, slice_spec, slice_spec, slice_spec,
                  pl.BlockSpec((4, Cout, C), lambda b, m: (0, 0, 0)),
                  pl.BlockSpec((Cout, 1), lambda b, m: (0, 0))],
        out_specs=pl.BlockSpec((1, Cout, tp), lambda b, m: (b, 0, m)),
        compiler_params=pltpu.CompilerParams(
            dimension_semantics=("parallel", "parallel"),
            allow_input_fusion=[True, True, True, True, False, False]),
        cost_estimate=cost,
    )(*slices, w4, b_f.reshape(Cout, 1))

    return out.reshape(B, Cout, Ho, Wo)


# ----------------------------------------------------------------------------
# Public entry point: use the fused path; fall back only if it fails to lower.
# ----------------------------------------------------------------------------
_FUSED_OK = None


def focus_forward(params, x, *, tm=8192):
    """x: (B, C, H, W) -> (B, c2, H//2, W//2), matching PyTorch Focus.forward."""
    global _FUSED_OK
    if _FUSED_OK is None:
        try:
            out = jax.block_until_ready(_focus_forward_fused(params, x, tm=tm))
            _FUSED_OK = True
            return out
        except Exception:   # lowering/compile failure only; numerics checked below
            _FUSED_OK = False
    if _FUSED_OK:
        return _focus_forward_fused(params, x, tm=tm)
    return _focus_forward_sliced(params, x, tm=tm)


# ----------------------------------------------------------------------------
# Pure-JAX reference (independent space-to-depth path + lax.conv) for checking
# ----------------------------------------------------------------------------
def focus_reference(params, x):
    cat = jnp.concatenate(
        [x[:, :, ::2, ::2], x[:, :, 1::2, ::2],
         x[:, :, ::2, 1::2], x[:, :, 1::2, 1::2]], axis=1)
    y = lax.conv_general_dilated(
        cat, params["w"], window_strides=(1, 1), padding="VALID",
        dimension_numbers=("NCHW", "OIHW", "NCHW"))
    scale = params["gamma"] / jnp.sqrt(params["rvar"] + _BN_EPS)
    shift = params["beta"] - params["rmean"] * scale
    y = y * scale[None, :, None, None] + shift[None, :, None, None]
    return y * jnp.clip(y + 3.0, 0.0, 6.0) / 6.0


# ----------------------------------------------------------------------------
if __name__ == "__main__":
    key = jax.random.PRNGKey(0)
    k_par, k_x = jax.random.split(key)

    B, c1, H, W = 2, 4, 16, 16
    c2 = 8

    params = make_focus_params(k_par, c1, c2)
    x = jax.random.normal(k_x, (B, c1, H, W), jnp.float32)

    out = jax.block_until_ready(focus_forward(params, x))
    ref = jax.block_until_ready(focus_reference(params, x))

    assert out.shape == (B, c2, H // 2, W // 2), out.shape
    assert jnp.allclose(out, ref, atol=1e-4, rtol=1e-4), (
        float(jnp.max(jnp.abs(out - ref))))

    print("KERNEL_OK")
</pallas_src>

<mosaic_0001>
module attributes {stable_mosaic.version = 11 : i64} {
  func.func @_focus_fused_kernel(%arg0: i32, %arg1: i32, %arg2: memref<1x4x8x32xf32, #tpu.memory_space<vmem>>, %arg3: memref<4x8x4xf32, #tpu.memory_space<vmem>>, %arg4: memref<8x1xf32, #tpu.memory_space<vmem>>, %arg5: memref<1x8x64xf32, #tpu.memory_space<vmem>>) attributes {dimension_semantics = [#tpu.dimension_semantics<parallel>, #tpu.dimension_semantics<parallel>], iteration_bounds = array<i64: 2, 1>, scalar_prefetch = 0 : i64, scratch_operands = 0 : i64, tpu.core_type = #tpu.core_type<tc>, window_params = [{transform_indices = @transform_0, window_bounds = array<i64: 1, 4, 8, 32>}, {pipeline_mode = #tpu.pipeline_mode<synchronous>, transform_indices = @transform_1, window_bounds = array<i64: 4, 8, 4>}, {pipeline_mode = #tpu.pipeline_mode<synchronous>, transform_indices = @transform_2, window_bounds = array<i64: 8, 1>}, {transform_indices = @transform_3, window_bounds = array<i64: 1, 8, 64>}]} {
    %c0 = arith.constant 0 : index
    %c0_0 = arith.constant 0 : index
    %c0_1 = arith.constant 0 : index
    %c0_2 = arith.constant 0 : index
    %0 = tpu.strided_load %arg2[%c0, %c0_0, %c0_1, %c0_2] {strides = array<i32: 1, 1, 1, 2>} : memref<1x4x8x32xf32, #tpu.memory_space<vmem>>, vector<1x4x8x8xf32>
    %1 = vector.shape_cast %0 : vector<1x4x8x8xf32> to vector<4x8x8xf32>
    %2 = vector.shape_cast %1 : vector<4x8x8xf32> to vector<4x64xf32>
    %c0_3 = arith.constant 0 : index
    %c0_4 = arith.constant 0 : index
    %c0_5 = arith.constant 0 : index
    %3 = vector.load %arg3[%c0_3, %c0_4, %c0_5] : memref<4x8x4xf32, #tpu.memory_space<vmem>>, vector<1x8x4xf32>
    %4 = vector.shape_cast %3 : vector<1x8x4xf32> to vector<8x4xf32>
    %cst = arith.constant dense<0.000000e+00> : vector<8x64xf32>
    %5 = tpu.matmul %4, %2, %cst {dimension_numbers = #tpu.dot_dimension_numbers<[1], [0], [0], [1], [0, 0, 1, 1], [], []>} : vector<8x4xf32>, vector<4x64xf32>, vector<8x64xf32> -> vector<8x64xf32>
    %c0_6 = arith.constant 0 : index
    %c0_7 = arith.constant 0 : index
    %c0_8 = arith.constant 0 : index
    %c16 = arith.constant 16 : index
    %6 = tpu.strided_load %arg2[%c0_6, %c0_7, %c0_8, %c16] {strides = array<i32: 1, 1, 1, 2>} : memref<1x4x8x32xf32, #tpu.memory_space<vmem>>, vector<1x4x8x8xf32>
    %7 = vector.shape_cast %6 : vector<1x4x8x8xf32> to vector<4x8x8xf32>
    %8 = vector.shape_cast %7 : vector<4x8x8xf32> to vector<4x64xf32>
    %c1 = arith.constant 1 : index
    %c0_9 = arith.constant 0 : index
    %c0_10 = arith.constant 0 : index
    %9 = vector.load %arg3[%c1, %c0_9, %c0_10] : memref<4x8x4xf32, #tpu.memory_space<vmem>>, vector<1x8x4xf32>
    %10 = vector.shape_cast %9 : vector<1x8x4xf32> to vector<8x4xf32>
    %cst_11 = arith.constant dense<0.000000e+00> : vector<8x64xf32>
    %11 = tpu.matmul %10, %8, %cst_11 {dimension_numbers = #tpu.dot_dimension_numbers<[1], [0], [0], [1], [0, 0, 1, 1], [], []>} : vector<8x4xf32>, vector<4x64xf32>, vector<8x64xf32> -> vector<8x64xf32>
    %12 = arith.addf %5, %11 : vector<8x64xf32>
    %c0_12 = arith.constant 0 : index
    %c0_13 = arith.constant 0 : index
    %c0_14 = arith.constant 0 : index
    %c1_15 = arith.constant 1 : index
    %13 = tpu.strided_load %arg2[%c0_12, %c0_13, %c0_14, %c1_15] {strides = array<i32: 1, 1, 1, 2>} : memref<1x4x8x32xf32, #tpu.memory_space<vmem>>, vector<1x4x8x8xf32>
    %14 = vector.shape_cast %13 : vector<1x4x8x8xf32> to vector<4x8x8xf32>
    %15 = vector.shape_cast %14 : vector<4x8x8xf32> to vector<4x64xf32>
    %c2 = arith.constant 2 : index
    %c0_16 = arith.constant 0 : index
    %c0_17 = arith.constant 0 : index
    %16 = vector.load %arg3[%c2, %c0_16, %c0_17] : memref<4x8x4xf32, #tpu.memory_space<vmem>>, vector<1x8x4xf32>
    %17 = vector.shape_cast %16 : vector<1x8x4xf32> to vector<8x4xf32>
    %cst_18 = arith.constant dense<0.000000e+00> : vector<8x64xf32>
    %18 = tpu.matmul %17, %15, %cst_18 {dimension_numbers = #tpu.dot_dimension_numbers<[1], [0], [0], [1], [0, 0, 1, 1], [], []>} : vector<8x4xf32>, vector<4x64xf32>, vector<8x64xf32> -> vector<8x64xf32>
    %19 = arith.addf %12, %18 : vector<8x64xf32>
    %c0_19 = arith.constant 0 : index
    %c0_20 = arith.constant 0 : index
    %c0_21 = arith.constant 0 : index
    %c17 = arith.constant 17 : index
    %20 = tpu.strided_load %arg2[%c0_19, %c0_20, %c0_21, %c17] {strides = array<i32: 1, 1, 1, 2>} : memref<1x4x8x32xf32, #tpu.memory_space<vmem>>, vector<1x4x8x8xf32>
    %21 = vector.shape_cast %20 : vector<1x4x8x8xf32> to vector<4x8x8xf32>
    %22 = vector.shape_cast %21 : vector<4x8x8xf32> to vector<4x64xf32>
    %c3 = arith.constant 3 : index
    %c0_22 = arith.constant 0 : index
    %c0_23 = arith.constant 0 : index
    %23 = vector.load %arg3[%c3, %c0_22, %c0_23] : memref<4x8x4xf32, #tpu.memory_space<vmem>>, vector<1x8x4xf32>
    %24 = vector.shape_cast %23 : vector<1x8x4xf32> to vector<8x4xf32>
    %cst_24 = arith.constant dense<0.000000e+00> : vector<8x64xf32>
    %25 = tpu.matmul %24, %22, %cst_24 {dimension_numbers = #tpu.dot_dimension_numbers<[1], [0], [0], [1], [0, 0, 1, 1], [], []>} : vector<8x4xf32>, vector<4x64xf32>, vector<8x64xf32> -> vector<8x64xf32>
    %26 = arith.addf %19, %25 : vector<8x64xf32>
    %c0_25 = arith.constant 0 : index
    %c0_26 = arith.constant 0 : index
    %27 = vector.load %arg4[%c0_25, %c0_26] : memref<8x1xf32, #tpu.memory_space<vmem>>, vector<8x1xf32>
    %28 = vector.broadcast %27 : vector<8x1xf32> to vector<8x64xf32>
    %29 = arith.addf %26, %28 : vector<8x64xf32>
    %cst_27 = arith.constant 3.000000e+00 : f32
    %30 = vector.broadcast %cst_27 : f32 to vector<8x64xf32>
    %31 = arith.addf %29, %30 : vector<8x64xf32>
    %cst_28 = arith.constant 0.000000e+00 : f32
    %cst_29 = arith.constant 6.000000e+00 : f32
    %32 = vector.broadcast %cst_28 : f32 to vector<8x64xf32>
    %33 = arith.maximumf %32, %31 : vector<8x64xf32>
    %34 = vector.broadcast %cst_29 : f32 to vector<8x64xf32>
    %35 = arith.minimumf %34, %33 : vector<8x64xf32>
    %36 = arith.mulf %29, %35 : vector<8x64xf32>
    %cst_30 = arith.constant 0.166666672 : f32
    %37 = vector.broadcast %cst_30 : f32 to vector<8x64xf32>
    %38 = arith.mulf %36, %37 : vector<8x64xf32>
    %c0_31 = arith.constant 0 : index
    %c0_32 = arith.constant 0 : index
    %c0_33 = arith.constant 0 : index
    %39 = vector.load %arg5[%c0_31, %c0_32, %c0_33] : memref<1x8x64xf32, #tpu.memory_space<vmem>>, vector<1x8x64xf32>
    %40 = vector.shape_cast %39 : vector<1x8x64xf32> to vector<8x64xf32>
    %41 = vector.shape_cast %38 : vector<8x64xf32> to vector<1x8x64xf32>
    tpu.vector_store %arg5[%c0_31, %c0_32, %c0_33], %41 {strides = array<i32>} : memref<1x8x64xf32, #tpu.memory_space<vmem>>, vector<1x8x64xf32>,
    return
  }
  func.func @transform_0(%arg0: i32, %arg1: i32) -> (i32, i32, i32, i32) {
    %c0_i32 = arith.constant 0 : i32
    %c0_i32_0 = arith.constant 0 : i32
    %c0_i32_1 = arith.constant 0 : i32
    return %arg0, %c0_i32, %arg1, %c0_i32_0 : i32, i32, i32, i32
  }
  func.func @transform_1(%arg0: i32, %arg1: i32) -> (i32, i32, i32) {
    %c0_i32 = arith.constant 0 : i32
    %c0_i32_0 = arith.constant 0 : i32
    %c0_i32_1 = arith.constant 0 : i32
    %c0_i32_2 = arith.constant 0 : i32
    return %c0_i32, %c0_i32_0, %c0_i32_1 : i32, i32, i32
  }
  func.func @transform_2(%arg0: i32, %arg1: i32) -> (i32, i32) {
    %c0_i32 = arith.constant 0 : i32
    %c0_i32_0 = arith.constant 0 : i32
    %c0_i32_1 = arith.constant 0 : i32
    return %c0_i32, %c0_i32_0 : i32, i32
  }
  func.func @transform_3(%arg0: i32, %arg1: i32) -> (i32, i32, i32) {
    %c0_i32 = arith.constant 0 : i32
    %c0_i32_0 = arith.constant 0 : i32
    return %arg0, %c0_i32, %arg1 : i32, i32, i32
  }
}

module attributes {stable_mosaic.version = 11 : i64} {
  func.func @_focus_slices_kernel(%arg0: i32, %arg1: i32, %arg2: memref<1x4x64xf32, #tpu.memory_space<vmem>>, %arg3: memref<1x4x64xf32, #tpu.memory_space<vmem>>, %arg4: memref<1x4x64xf32, #tpu.memory_space<vmem>>, %arg5: memref<1x4x64xf32, #tpu.memory_space<vmem>>, %arg6: memref<4x8x4xf32, #tpu.memory_space<vmem>>, %arg7: memref<8x1xf32, #tpu.memory_space<vmem>>, %arg8: memref<1x8x64xf32, #tpu.memory_space<vmem>>) attributes {dimension_semantics = [#tpu.dimension_semantics<parallel>, #tpu.dimension_semantics<parallel>], iteration_bounds = array<i64: 2, 1>, scalar_prefetch = 0 : i64, scratch_operands = 0 : i64, tpu.core_type = #tpu.core_type<tc>, window_params = [{transform_indices = @transform_0, window_bounds = array<i64: 1, 4, 64>}, {transform_indices = @transform_1, window_bounds = array<i64: 1, 4, 64>}, {transform_indices = @transform_2, window_bounds = array<i64: 1, 4, 64>}, {transform_indices = @transform_3, window_bounds = array<i64: 1, 4, 64>}, {pipeline_mode = #tpu.pipeline_mode<synchronous>, transform_indices = @transform_4, window_bounds = array<i64: 4, 8, 4>}, {pipeline_mode = #tpu.pipeline_mode<synchronous>, transform_indices = @transform_5, window_bounds = array<i64: 8, 1>}, {transform_indices = @transform_6, window_bounds = array<i64: 1, 8, 64>}]} {
    %c0 = arith.constant 0 : index
    %c0_0 = arith.constant 0 : index
    %c0_1 = arith.constant 0 : index
    %0 = vector.load %arg6[%c0, %c0_0, %c0_1] : memref<4x8x4xf32, #tpu.memory_space<vmem>>, vector<1x8x4xf32>
    %1 = vector.shape_cast %0 : vector<1x8x4xf32> to vector<8x4xf32>
    %c0_2 = arith.constant 0 : index
    %c0_3 = arith.constant 0 : index
    %c0_4 = arith.constant 0 : index
    %2 = vector.load %arg2[%c0_2, %c0_3, %c0_4] : memref<1x4x64xf32, #tpu.memory_space<vmem>>, vector<1x4x64xf32>
    %3 = vector.shape_cast %2 : vector<1x4x64xf32> to vector<4x64xf32>
    %cst = arith.constant dense<0.000000e+00> : vector<8x64xf32>
    %4 = tpu.matmul %1, %3, %cst {dimension_numbers = #tpu.dot_dimension_numbers<[1], [0], [0], [1], [0, 0, 1, 1], [], []>} : vector<8x4xf32>, vector<4x64xf32>, vector<8x64xf32> -> vector<8x64xf32>
    %c1 = arith.constant 1 : index
    %c0_5 = arith.constant 0 : index
    %c0_6 = arith.constant 0 : index
    %5 = vector.load %arg6[%c1, %c0_5, %c0_6] : memref<4x8x4xf32, #tpu.memory_space<vmem>>, vector<1x8x4xf32>
    %6 = vector.shape_cast %5 : vector<1x8x4xf32> to vector<8x4xf32>
    %c0_7 = arith.constant 0 : index
    %c0_8 = arith.constant 0 : index
    %c0_9 = arith.constant 0 : index
    %7 = vector.load %arg3[%c0_7, %c0_8, %c0_9] : memref<1x4x64xf32, #tpu.memory_space<vmem>>, vector<1x4x64xf32>
    %8 = vector.shape_cast %7 : vector<1x4x64xf32> to vector<4x64xf32>
    %cst_10 = arith.constant dense<0.000000e+00> : vector<8x64xf32>
    %9 = tpu.matmul %6, %8, %cst_10 {dimension_numbers = #tpu.dot_dimension_numbers<[1], [0], [0], [1], [0, 0, 1, 1], [], []>} : vector<8x4xf32>, vector<4x64xf32>, vector<8x64xf32> -> vector<8x64xf32>
    %10 = arith.addf %4, %9 : vector<8x64xf32>
    %c2 = arith.constant 2 : index
    %c0_11 = arith.constant 0 : index
    %c0_12 = arith.constant 0 : index
    %11 = vector.load %arg6[%c2, %c0_11, %c0_12] : memref<4x8x4xf32, #tpu.memory_space<vmem>>, vector<1x8x4xf32>
    %12 = vector.shape_cast %11 : vector<1x8x4xf32> to vector<8x4xf32>
    %c0_13 = arith.constant 0 : index
    %c0_14 = arith.constant 0 : index
    %c0_15 = arith.constant 0 : index
    %13 = vector.load %arg4[%c0_13, %c0_14, %c0_15] : memref<1x4x64xf32, #tpu.memory_space<vmem>>, vector<1x4x64xf32>
    %14 = vector.shape_cast %13 : vector<1x4x64xf32> to vector<4x64xf32>
    %cst_16 = arith.constant dense<0.000000e+00> : vector<8x64xf32>
    %15 = tpu.matmul %12, %14, %cst_16 {dimension_numbers = #tpu.dot_dimension_numbers<[1], [0], [0], [1], [0, 0, 1, 1], [], []>} : vector<8x4xf32>, vector<4x64xf32>, vector<8x64xf32> -> vector<8x64xf32>
    %16 = arith.addf %10, %15 : vector<8x64xf32>
    %c3 = arith.constant 3 : index
    %c0_17 = arith.constant 0 : index
    %c0_18 = arith.constant 0 : index
    %17 = vector.load %arg6[%c3, %c0_17, %c0_18] : memref<4x8x4xf32, #tpu.memory_space<vmem>>, vector<1x8x4xf32>
    %18 = vector.shape_cast %17 : vector<1x8x4xf32> to vector<8x4xf32>
    %c0_19 = arith.constant 0 : index
    %c0_20 = arith.constant 0 : index
    %c0_21 = arith.constant 0 : index
    %19 = vector.load %arg5[%c0_19, %c0_20, %c0_21] : memref<1x4x64xf32, #tpu.memory_space<vmem>>, vector<1x4x64xf32>
    %20 = vector.shape_cast %19 : vector<1x4x64xf32> to vector<4x64xf32>
    %cst_22 = arith.constant dense<0.000000e+00> : vector<8x64xf32>
    %21 = tpu.matmul %18, %20, %cst_22 {dimension_numbers = #tpu.dot_dimension_numbers<[1], [0], [0], [1], [0, 0, 1, 1], [], []>} : vector<8x4xf32>, vector<4x64xf32>, vector<8x64xf32> -> vector<8x64xf32>
    %22 = arith.addf %16, %21 : vector<8x64xf32>
    %c0_23 = arith.constant 0 : index
    %c0_24 = arith.constant 0 : index
    %23 = vector.load %arg7[%c0_23, %c0_24] : memref<8x1xf32, #tpu.memory_space<vmem>>, vector<8x1xf32>
    %24 = vector.broadcast %23 : vector<8x1xf32> to vector<8x64xf32>
    %25 = arith.addf %22, %24 : vector<8x64xf32>
    %cst_25 = arith.constant 3.000000e+00 : f32
    %26 = vector.broadcast %cst_25 : f32 to vector<8x64xf32>
    %27 = arith.addf %25, %26 : vector<8x64xf32>
    %cst_26 = arith.constant 0.000000e+00 : f32
    %cst_27 = arith.constant 6.000000e+00 : f32
    %28 = vector.broadcast %cst_26 : f32 to vector<8x64xf32>
    %29 = arith.maximumf %28, %27 : vector<8x64xf32>
    %30 = vector.broadcast %cst_27 : f32 to vector<8x64xf32>
    %31 = arith.minimumf %30, %29 : vector<8x64xf32>
    %32 = arith.mulf %25, %31 : vector<8x64xf32>
    %cst_28 = arith.constant 0.166666672 : f32
    %33 = vector.broadcast %cst_28 : f32 to vector<8x64xf32>
    %34 = arith.mulf %32, %33 : vector<8x64xf32>
    %c0_29 = arith.constant 0 : index
    %c0_30 = arith.constant 0 : index
    %c0_31 = arith.constant 0 : index
    %35 = vector.load %arg8[%c0_29, %c0_30, %c0_31] : memref<1x8x64xf32, #tpu.memory_space<vmem>>, vector<1x8x64xf32>
    %36 = vector.shape_cast %35 : vector<1x8x64xf32> to vector<8x64xf32>
    %37 = vector.shape_cast %34 : vector<8x64xf32> to vector<1x8x64xf32>
    tpu.vector_store %arg8[%c0_29, %c0_30, %c0_31], %37 {strides = array<i32>} : memref<1x8x64xf32, #tpu.memory_space<vmem>>, vector<1x8x64xf32>,
    return
  }
  func.func @transform_0(%arg0: i32, %arg1: i32) -> (i32, i32, i32) {
    %c0_i32 = arith.constant 0 : i32
    %c0_i32_0 = arith.constant 0 : i32
    return %arg0, %c0_i32, %arg1 : i32, i32, i32
  }
  func.func @transform_1(%arg0: i32, %arg1: i32) -> (i32, i32, i32) {
    %c0_i32 = arith.constant 0 : i32
    %c0_i32_0 = arith.constant 0 : i32
    return %arg0, %c0_i32, %arg1 : i32, i32, i32
  }
  func.func @transform_2(%arg0: i32, %arg1: i32) -> (i32, i32, i32) {
    %c0_i32 = arith.constant 0 : i32
    %c0_i32_0 = arith.constant 0 : i32
    return %arg0, %c0_i32, %arg1 : i32, i32, i32
  }
  func.func @transform_3(%arg0: i32, %arg1: i32) -> (i32, i32, i32) {
    %c0_i32 = arith.constant 0 : i32
    %c0_i32_0 = arith.constant 0 : i32
    return %arg0, %c0_i32, %arg1 : i32, i32, i32
  }
  func.func @transform_4(%arg0: i32, %arg1: i32) -> (i32, i32, i32) {
    %c0_i32 = arith.constant 0 : i32
    %c0_i32_0 = arith.constant 0 : i32
    %c0_i32_1 = arith.constant 0 : i32
    %c0_i32_2 = arith.constant 0 : i32
    return %c0_i32, %c0_i32_0, %c0_i32_1 : i32, i32, i32
  }
  func.func @transform_5(%arg0: i32, %arg1: i32) -> (i32, i32) {
    %c0_i32 = arith.constant 0 : i32
    %c0_i32_0 = arith.constant 0 : i32
    %c0_i32_1 = arith.constant 0 : i32
    return %c0_i32, %c0_i32_0 : i32, i32
  }
  func.func @transform_6(%arg0: i32, %arg1: i32) -> (i32, i32, i32) {
    %c0_i32 = arith.constant 0 : i32
    %c0_i32_0 = arith.constant 0 : i32
    return %arg0, %c0_i32, %arg1 : i32, i32, i32
  }
}

</mosaic_0001>

<bundles_post_ra>
// kernel: _focus_forward_sliced.1
= control target key start
LH: loop header
LB: loop body
LE: loop exit
PB: predicated region body
PF: predicated region fallthrough
CT: control target
= control target key end

     0   :  { %s955_s21 = smov 0   ;;  %s957_s22 = smov 0   ;;  %s1028_s0 = inlined_call_operand.vmem [shape: f32[2,4,64], index: 0, kind: input, shape index: {}]   ;;  %s1029_s1 = inlined_call_operand.vmem [shape: f32[2,4,64], index: 1, kind: input, shape index: {}]   ;;  %s1030_s2 = inlined_call_operand.vmem [shape: f32[2,4,64], index: 2, kind: input, shape index: {}]   ;;  %s1031_s3 = inlined_call_operand.vmem [shape: f32[2,4,64], index: 3, kind: input, shape index: {}]   ;;  %s1032_s4 = inlined_call_operand.vmem [shape: f32[4,8,4], index: 4, kind: input, shape index: {}]   ;;  %s1033_s5 = inlined_call_operand.vmem [shape: f32[8,1], index: 5, kind: input, shape index: {}]   ;;  %s1034_s6 = inlined_call_operand.vmem [shape: f32[2,8,64], index: 6, kind: output, shape index: {}]  }
   0x1   :  { %s959_s23 = smov 0  }
   0x2 LB: > { %s28_s24 = sadd.s32 1, %s911_s22  ;;  %p818_p0 = scmp.ge.s32.totalorder %s915_s23, 1  ;;  %s915_s23 = sphi %s959_s23, %s16_s23   ;;  %s911_s22 = sphi %s957_s22, %s1036_s22   ;;  %s907_s21 = sphi %s955_s21, %s1035_s21  }
   0x3   : > { %p30_p1 = scmp.ge.s32.totalorder %s28_s24, 2  ;;  %p272_p2 = scmp.lt.s32.totalorder %s915_s23, 3 }
   0x5   : > { %s1038_s24 = smov (%p30_p1, %s28_s24), 0  ;;  %p273_p3 = pnand %p818_p0, %p272_p2 }
   0x6   : > { %p327_p4 = scmp.lt.s32.totalorder (!%p273_p3), %s907_s21, 1 }
   0x7   : > { %276 = sbr.rel (%p273_p3) target bundleno = 231 (0xe7), region = 44 }
   0xc   : > { %v917_v0 = vmov 0.0   ;;  %vm918_vm0 = vmmov 0   ;;  %s1040_s21 = smov (!%p327_p4, %s907_s21), 1  ;;  %v681_v1 = vld [vmem:[%s1033_s5] sm:$0xff]  ;;  %v919_v2 = vmov 0   ;;  %vm371_vm1 = vcmask 1043456  }
   0xd   : > { %845 = vmatprep.subr.mxu0 %v917_v0  ;;  %847 = vmatprep.mubr.msk.f32.mxu0 %vm918_vm0, %v917_v0  ;;  %s819_s27 = sshll.u32 %s1040_s21, 2  ;;  %v824_v3 = vld [vmem:[%s1032_s4 + $0x8] sm:$0xff]  ;;  %vm367_vm2 = vcmask 31744   ;;  %v362_v6 = vld [vmem:[%s1032_s4] sm:$0xff]  ;;  %v829_v9 = vld [vmem:[%s1032_s4 + $0x10] sm:$0xff]  ;;  %s823_s28 = sshll.u32 %s1040_s21, 3 }
   0xe   : > { %850 = vmatprep.subr.mxu1 %v917_v0  ;;  %852 = vmatprep.mubr.msk.f32.mxu1 %vm918_vm0, %v917_v0  ;;  %s340_s30 = scalar_lea.vmem %s1029_s1, %s819_s27  ;;  %s333_s11 = scalar_lea.vmem %s1028_s0, %s819_s27  ;;  %v832_v10 = vld [vmem:[%s1032_s4 + $0x18] sm:$0xff]  ;;  %vm693_vm3 = vcmask 523264  }
   0xf   : > { %892 = vset.pattern.permute.xlu0 %v919_v2  ;;  %v366_v4 = vld [vmem:[%s340_s30] sm:$0xf]  ;;  %s347_s16 = scalar_lea.vmem %s1030_s2, %s819_s27  ;;  %s354_s19 = scalar_lea.vmem %s1031_s3, %s819_s27 }
  0x10   : > { %684 = vperm.xlu0 %892, %v681_v1   ;;  %v363_v5 = vld [vmem:[%s333_s11] sm:$0xf]  ;;  %846 = vmatpush3.msk.msra.mxu0 %vm371_vm1, %v366_v4  ;;  %s361_s7 = scalar_lea.vmem %s1034_s6, %s823_s28 }
  0x11   : > { %851 = vmatpush3.msk.msra.mxu1 %vm371_vm1, %v363_v5  ;;  %v523_v7 = vld [vmem:[%s347_s16] sm:$0xf]  ;;  %848 = vmatmul.mubr.msk.f32.vlgmr.msra.gmra.mxu0 %vm367_vm2, %v824_v3 }
  0x12   : > { %855 = vmatprep.subr.mxu0 %v917_v0  ;;  %v603_v8 = vld [vmem:[%s354_s19] sm:$0xf]  ;;  %853 = vmatmul.mubr.msk.f32.vlgmr.msra.gmra.mxu1 %vm367_vm2, %v362_v6 }
  0x13   : > { %856 = vmatpush3.msk.msra.mxu0 %vm371_vm1, %v523_v7  ;;  %860 = vmatprep.subr.mxu1 %v917_v0 }
  0x14   : > { %857 = vmatprep.mubr.msk.f32.mxu0 %vm918_vm0, %v917_v0  ;;  %861 = vmatpush3.msk.msra.mxu1 %vm371_vm1, %v603_v8 }
  0x15   : > { %862 = vmatprep.mubr.msk.f32.mxu1 %vm918_vm0, %v917_v0  ;;  %858 = vmatmul.mubr.msk.f32.vlgmr.msra.gmra.mxu0 %vm367_vm2, %v829_v9 }
  0x16   : > { %863 = vmatmul.mubr.msk.f32.vlgmr.msra.gmra.mxu1 %vm367_vm2, %v832_v10 }
  0x8b   : > { %v685_v20 = vpop.permute.xlu0 %684 }
  0xd1   : > { %v441_v11 = vpop.f32.mrf.mxu0 }
  0xd2   : > { %v517_v12 = vpop.f32.mrf.mxu1 }
  0xd3   : > { %v849_v13 = vpop.f32.mrf.mxu0  ;;  %v518_v14 = vadd.f32 %v517_v12, %v441_v11 }
  0xd4   : > { %v854_v15 = vpop.f32.mrf.mxu1 }
  0xd5   : > { %v596_v16 = vpop.f32.mrf.mxu0 }
  0xd6   : > { %v600_v17 = vadd.f32 %v596_v16, %v518_v14  ;;  %v676_v18 = vpop.f32.mrf.mxu1 }
  0xd7   : > { %v859_v19 = vpop.f32.mrf.mxu0 }
  0xd8   : > { %v680_v21 = vadd.f32 %v676_v18, %v600_v17  ;;  %v864_v22 = vpop.f32.mrf.mxu1 }
  0xda   : > { %v687_v23 = vadd.f32 %v685_v20, %v680_v21 }
  0xdc   : > { %v688_v24 = vadd.f32 3.0, %v687_v23 }
  0xde   : > { %v689_v25 = vmax.f32 %v688_v24, 0.0 }
  0xe0   : > { %v690_v26 = vmin.f32 %v689_v25, 6.0 }
  0xe2   : > { %v691_v27 = vmul.f32 %v690_v26, %v687_v23 }
  0xe4   : > { %v692_v28 = vmul.f32 0.16666667, %v691_v27 }
  0xe6   : > { %694 = vst.msk [vmem:[%s361_s7] sm:$0xff] %vm693_vm3, %v692_v28 }
  0xe7 PF: > { %s16_s23 = sadd.s32 1, %s915_s23   ;;  %s1035_s21 = smov %s911_s22 }
  0xe8   : > { %p13_p5 = scmp.ge.s32.totalorder %s16_s23, 4   ;;  %s1036_s22 = smov %s1038_s24 }
  0xea   :  { %15 = sbr.rel (!%p13_p5) target bundleno = 2 (0x2), region = 86 }

</bundles_post_ra>
